<compile_context>
chip_gen: v6e
topology: v6e:2x2x1
jax: 0.10.0
libtpu: 0.0.40
codegen_flags: <defaults>
</compile_context>

<pallas_src>
import math
from typing import NamedTuple

import jax
import jax.numpy as jnp
from jax import lax
from jax.experimental import pallas as pl
from jax.experimental.pallas import tpu as pltpu

_INV_SQRT2 = 1.0 / math.sqrt(2.0)


def _round_up(x, m):
    return ((x + m - 1) // m) * m


def _vmem_budget_bytes():
    """85% of physical VMEM (leave headroom for compiler scratch/semaphores)."""
    phys = 64 * 1024 * 1024  # conservative fallback (v7x-sized)
    try:
        info = pltpu.get_tpu_info()
        phys = int(getattr(info, "vmem_capacity_bytes", phys)) or phys
    except Exception:
        pass
    return int(phys * 0.85)


def _pick_th(hid_p, max_th):
    """Largest multiple of 128 that divides hid_p and is <= max_th (>= 128)."""
    best = 128
    t = 256
    while t <= min(hid_p, max_th):
        if hid_p % t == 0:
            best = t
        t += 128
    return best


# ----------------------------------------------------------------------------
# Kernel
# ----------------------------------------------------------------------------
def _ffn_kernel(x_ref, w1_ref, b1_ref, w2_ref, b2_ref, o_ref, acc_ref):
    # x_ref : (TM, DIMP)           compute dtype (bf16 by default)
    # w1_ref: (DIMP, 2*TH)         this hidden tile's [value | gate] columns
    # b1_ref: (1, 2*TH)   f32
    # w2_ref: (TH, DIMP)           compute dtype
    # b2_ref: (1, DIMP)   f32
    # o_ref : (TM, DIMP)           acc_ref: (TM, DIMP) f32 scratch
    h = pl.program_id(1)

    @pl.when(h == 0)
    def _():
        acc_ref[...] = jnp.zeros_like(acc_ref)

    th = w2_ref.shape[0]

    # First linear: single fused MXU run over both halves of this hidden tile.
    h12 = jnp.dot(x_ref[...], w1_ref[...], preferred_element_type=jnp.float32)
    h12 = h12 + b1_ref[...]
    hx = h12[:, :th]          # "value" half (TH is a multiple of 128 -> lane-aligned)
    hg = h12[:, th:]          # "gate" half

    # Exact (erf) GELU in f32 -> matches torch.nn.functional.gelu default.
    gelu_g = 0.5 * hg * (1.0 + lax.erf(hg * _INV_SQRT2))
    act = (hx * gelu_g).astype(w2_ref.dtype)

    # Second linear: accumulate the partial product over hidden tiles.
    acc_ref[...] += jnp.dot(act, w2_ref[...], preferred_element_type=jnp.float32)

    @pl.when(h == pl.num_programs(1) - 1)
    def _():
        o_ref[...] = (acc_ref[...] + b2_ref[...]).astype(o_ref.dtype)


# ----------------------------------------------------------------------------
# One-time weight preprocessing (hoisted out of the per-call wrapper)
# ----------------------------------------------------------------------------
class PreparedFFN(NamedTuple):
    w1cat: jax.Array   # (dim_p, 2*hid_p), per-TH-tile [value | gate] interleave
    b1cat: jax.Array   # (1, 2*hid_p) f32, same interleave
    w2: jax.Array      # (hid_p, dim_p)
    b2: jax.Array      # (1, dim_p) f32
    dim: int
    hid: int
    dim_p: int
    hid_p: int
    th: int


def prepare_feed_forward_params(w1, b1, w2, b2, *,
                                compute_dtype=jnp.bfloat16, th=None):
    """Split W1 into value/gate halves, pad to (8,128)-friendly shapes, cast
    to the MXU compute dtype, and interleave per hidden tile so the kernel
    fetches a single (DIMP, 2*TH) W1 block per grid step."""
    dim, hid2 = w1.shape
    hid = hid2 // 2
    assert w1.shape == (dim, 2 * hid) and w2.shape == (hid, dim)
    assert b1.shape == (2 * hid,) and b2.shape == (dim,)

    dim_p = _round_up(dim, 128)
    hid_p = _round_up(hid, 128)

    budget = _vmem_budget_bytes()
    w_bpe = jnp.dtype(compute_dtype).itemsize
    th = _pick_th(hid_p, 512 if th is None else th)
    # Keep double-buffered weight tiles well under the budget so x/out/acc fit.
    while th > 128 and 2 * (dim_p * 2 * th + th * dim_p) * w_bpe > 0.6 * budget:
        th = _pick_th(hid_p, th // 2)

    w1x, w1g = w1[:, :hid], w1[:, hid:]
    b1x, b1g = b1[:hid], b1[hid:]

    w1x_p = jnp.pad(w1x, ((0, dim_p - dim), (0, hid_p - hid))).astype(compute_dtype)
    w1g_p = jnp.pad(w1g, ((0, dim_p - dim), (0, hid_p - hid))).astype(compute_dtype)
    w2_p = jnp.pad(w2, ((0, hid_p - hid), (0, dim_p - dim))).astype(compute_dtype)

    nh = hid_p // th
    w1cat = jnp.stack(
        [w1x_p.reshape(dim_p, nh, th), w1g_p.reshape(dim_p, nh, th)], axis=2
    ).reshape(dim_p, 2 * hid_p)

    b1x_p = jnp.pad(b1x.astype(jnp.float32), (0, hid_p - hid))
    b1g_p = jnp.pad(b1g.astype(jnp.float32), (0, hid_p - hid))
    b1cat = jnp.stack(
        [b1x_p.reshape(nh, th), b1g_p.reshape(nh, th)], axis=1
    ).reshape(1, 2 * hid_p)
    b2_p = jnp.pad(b2.astype(jnp.float32), (0, dim_p - dim)).reshape(1, dim_p)

    return PreparedFFN(w1cat, b1cat, w2_p, b2_p, dim, hid, dim_p, hid_p, th)


# ----------------------------------------------------------------------------
# Forward pass
# ----------------------------------------------------------------------------
def feed_forward_prepared(x, p: PreparedFFN, *, tm=None):
    """x: (..., dim) -> (..., dim), using preprocessed params."""
    out_dtype = x.dtype
    dim, dim_p, hid_p, th = p.dim, p.dim_p, p.hid_p, p.th
    assert x.shape[-1] == dim

    compute_dtype = p.w1cat.dtype
    x = x.astype(compute_dtype)

    lead_shape = x.shape[:-1]
    m = math.prod(lead_shape) if lead_shape else 1
    x2d = x.reshape(m, dim)

    budget = _vmem_budget_bytes()
    in_bpe = jnp.dtype(compute_dtype).itemsize
    out_bpe = jnp.dtype(out_dtype).itemsize

    row_mult = 16  # bf16 packs 16 rows per packed sublane group (fine for f32 too)
    if tm is None:
        # 128-MiB parts (v5e/v6e) can afford the bigger, roofline-reaching tile.
        tm = 512 if budget >= 96 * 1024 * 1024 else 384
    tm_eff = max(row_mult,
                 min(_round_up(tm, row_mult), _round_up(max(m, 1), row_mult)))

    def est(tm_):
        return (2 * tm_ * dim_p * in_bpe            # x tile (double-buffered)
                + 2 * dim_p * 2 * th * in_bpe       # W1 [val|gate] tile
                + 2 * th * dim_p * in_bpe           # W2 tile
                + 2 * (2 * th + dim_p) * 4          # biases (f32)
                + 2 * tm_ * dim_p * out_bpe         # out tile
                + tm_ * dim_p * 4)                  # f32 accumulator

    while tm_eff > row_mult and est(tm_eff) > budget:
        tm_eff = max(row_mult, (tm_eff // 2 // row_mult) * row_mult)

    m_p = _round_up(max(m, 1), tm_eff)
    x2d = jnp.pad(x2d, ((0, m_p - m), (0, dim_p - dim)))

    grid = (m_p // tm_eff, hid_p // th)

    # TODO(synk): for single-row-tile (decode-style) shapes on v7x, split the
    # hidden axis across the two TensorCores (CORE_PARALLEL / core_map) instead
    # of relying on the M axis alone; likewise, for very large M a weight tile
    # could be reused across several row sub-tiles via an inner emit_pipeline.

    out2d = pl.pallas_call(
        _ffn_kernel,
        out_shape=jax.ShapeDtypeStruct((m_p, dim_p), out_dtype),
        grid_spec=pltpu.PrefetchScalarGridSpec(
            num_scalar_prefetch=0,
            grid=grid,
            in_specs=[
                pl.BlockSpec((tm_eff, dim_p), lambda i, h: (i, 0)),    # x
                pl.BlockSpec((dim_p, 2 * th), lambda i, h: (0, h)),    # W1 [val|gate]
                pl.BlockSpec((1, 2 * th), lambda i, h: (0, h)),        # b1 [val|gate]
                pl.BlockSpec((th, dim_p), lambda i, h: (h, 0)),        # W2
                pl.BlockSpec((1, dim_p), lambda i, h: (0, 0)),         # b2
            ],
            out_specs=pl.BlockSpec((tm_eff, dim_p), lambda i, h: (i, 0)),
            scratch_shapes=[pltpu.VMEM((tm_eff, dim_p), jnp.float32)],
        ),
        compiler_params=pltpu.CompilerParams(
            dimension_semantics=("parallel", "arbitrary"),
            vmem_limit_bytes=budget,
        ),
    )(x2d, p.w1cat, p.b1cat, p.w2, p.b2)

    out2d = out2d[:m, :dim]
    return out2d.reshape(*lead_shape, dim)


def feed_forward(x, w1, b1, w2, b2, *,
                 compute_dtype=jnp.bfloat16, tm=None, th=None):
    """Convenience wrapper: preprocess weights then run the kernel.
    For repeated calls with the same weights, call prepare_feed_forward_params
    once and use feed_forward_prepared (avoids re-reading all weights per call)."""
    p = prepare_feed_forward_params(w1, b1, w2, b2,
                                    compute_dtype=compute_dtype, th=th)
    return feed_forward_prepared(x, p, tm=tm)


# ----------------------------------------------------------------------------
# Reference + init
# ----------------------------------------------------------------------------
def init_feed_forward_params(key, dim, mult):
    """nn.Linear-style init; weights stored (in, out) = .weight.T."""
    k1, k2, k3, k4 = jax.random.split(key, 4)
    hid = dim * mult
    bound1 = 1.0 / math.sqrt(dim)
    bound2 = 1.0 / math.sqrt(hid)
    w1 = jax.random.uniform(k1, (dim, hid * 2), jnp.float32, -bound1, bound1)
    b1 = jax.random.uniform(k2, (hid * 2,), jnp.float32, -bound1, bound1)
    w2 = jax.random.uniform(k3, (hid, dim), jnp.float32, -bound2, bound2)
    b2 = jax.random.uniform(k4, (dim,), jnp.float32, -bound2, bound2)
    return w1, b1, w2, b2


def feed_forward_ref(x, w1, b1, w2, b2):
    """Pure-JAX reference matching the PyTorch module semantics."""
    h = x @ w1 + b1
    hid = h.shape[-1] // 2
    x_part, gates = h[..., :hid], h[..., hid:]
    gelu = 0.5 * gates * (1.0 + lax.erf(gates / jnp.sqrt(2.0)))
    return (x_part * gelu) @ w2 + b2


if __name__ == "__main__":
    key = jax.random.PRNGKey(0)

    # --- test 1: toy module shapes (dim=32, mult=4), f32 exact-parity path ---
    DIM, MULT, BATCH, SEQ = 32, 4, 2, 8
    kx, kp, key = jax.random.split(key, 3)
    x = jax.random.normal(kx, (BATCH, SEQ, DIM), jnp.float32)
    w1, b1, w2, b2 = init_feed_forward_params(kp, DIM, MULT)

    out = feed_forward(x, w1, b1, w2, b2, compute_dtype=jnp.float32)
    out = jax.block_until_ready(out)
    ref = feed_forward_ref(x, w1, b1, w2, b2)
    assert out.shape == (BATCH, SEQ, DIM)
    assert jnp.allclose(out, ref, atol=1e-5, rtol=1e-5), "f32 mismatch (small)"

    # --- test 2: multi-tile grid (row tiles x hidden tiles), f32 path --------
    DIM2, MULT2 = 128, 4                       # hid = 512
    kx2, kp2, key = jax.random.split(key, 3)
    x2 = jax.random.normal(kx2, (4, 64, DIM2), jnp.float32)
    p2_raw = init_feed_forward_params(kp2, DIM2, MULT2)

    out2 = feed_forward(x2, *p2_raw, compute_dtype=jnp.float32, tm=64, th=128)
    out2 = jax.block_until_ready(out2)
    ref2 = feed_forward_ref(x2, *p2_raw)
    assert jnp.allclose(out2, ref2, atol=1e-4, rtol=1e-4), "f32 mismatch (tiled)"

    # --- test 3: default bf16 MXU path via hoisted prepared params -----------
    p2_prep = prepare_feed_forward_params(*p2_raw, th=128)   # bf16 default
    out3 = feed_forward_prepared(x2, p2_prep, tm=64)
    out3 = jax.block_until_ready(out3)
    assert jnp.allclose(out3, ref2, atol=1e-1, rtol=1e-1), "bf16 path mismatch"

    print("KERNEL_OK")
</pallas_src>

<mosaic_0001>
module attributes {stable_mosaic.version = 11 : i64} {
  func.func @_ffn_kernel(%arg0: i32, %arg1: i32, %arg2: memref<16x128xf32, #tpu.memory_space<vmem>>, %arg3: memref<128x256xf32, #tpu.memory_space<vmem>>, %arg4: memref<1x256xf32, #tpu.memory_space<vmem>>, %arg5: memref<128x128xf32, #tpu.memory_space<vmem>>, %arg6: memref<1x128xf32, #tpu.memory_space<vmem>>, %arg7: memref<16x128xf32, #tpu.memory_space<vmem>>, %arg8: memref<16x128xf32, #tpu.memory_space<vmem>>) attributes {dimension_semantics = [#tpu.dimension_semantics<parallel>, #tpu.dimension_semantics<arbitrary>], iteration_bounds = array<i64: 1, 1>, scalar_prefetch = 0 : i64, scratch_operands = 1 : i64, tpu.core_type = #tpu.core_type<tc>, window_params = [{transform_indices = @transform_0, window_bounds = array<i64: 16, 128>}, {transform_indices = @transform_1, window_bounds = array<i64: 128, 256>}, {transform_indices = @transform_2, window_bounds = array<i64: 1, 256>}, {transform_indices = @transform_3, window_bounds = array<i64: 128, 128>}, {pipeline_mode = #tpu.pipeline_mode<synchronous>, transform_indices = @transform_4, window_bounds = array<i64: 1, 128>}, {transform_indices = @transform_5, window_bounds = array<i64: 16, 128>}]} {
    %c0_i32 = arith.constant 0 : i32
    %0 = arith.cmpi eq, %arg1, %c0_i32 : i32
    %1 = arith.extui %0 : i1 to i32
    %c0_i32_0 = arith.constant 0 : i32
    %2 = arith.cmpi ne, %1, %c0_i32_0 : i32
    scf.if %2 {
      %cst_18 = arith.constant 0.000000e+00 : f32
      %28 = vector.broadcast %cst_18 : f32 to vector<16x128xf32>
      %c0_19 = arith.constant 0 : index
      %c0_20 = arith.constant 0 : index
      %29 = vector.load %arg8[%c0_19, %c0_20] : memref<16x128xf32, #tpu.memory_space<vmem>>, vector<16x128xf32>
      tpu.vector_store %arg8[%c0_19, %c0_20], %28 {strides = array<i32>} : memref<16x128xf32, #tpu.memory_space<vmem>>, vector<16x128xf32>,
    } else {
    }
    %c0 = arith.constant 0 : index
    %c0_1 = arith.constant 0 : index
    %3 = vector.load %arg2[%c0, %c0_1] : memref<16x128xf32, #tpu.memory_space<vmem>>, vector<16x128xf32>
    %c0_2 = arith.constant 0 : index
    %c0_3 = arith.constant 0 : index
    %4 = vector.load %arg3[%c0_2, %c0_3] : memref<128x256xf32, #tpu.memory_space<vmem>>, vector<128x256xf32>
    %cst = arith.constant dense<0.000000e+00> : vector<16x256xf32>
    %5 = tpu.matmul %3, %4, %cst {dimension_numbers = #tpu.dot_dimension_numbers<[1], [0], [0], [1], [0, 0, 1, 1], [], []>} : vector<16x128xf32>, vector<128x256xf32>, vector<16x256xf32> -> vector<16x256xf32>
    %c0_4 = arith.constant 0 : index
    %c0_5 = arith.constant 0 : index
    %6 = vector.load %arg4[%c0_4, %c0_5] : memref<1x256xf32, #tpu.memory_space<vmem>>, vector<1x256xf32>
    %7 = vector.broadcast %6 : vector<1x256xf32> to vector<16x256xf32>
    %8 = arith.addf %5, %7 : vector<16x256xf32>
    %9 = vector.extract_strided_slice %8 {offsets = [0, 0], sizes = [16, 128], strides = [1, 1]} : vector<16x256xf32> to vector<16x128xf32>
    %10 = vector.extract_strided_slice %8 {offsets = [0, 128], sizes = [16, 128], strides = [1, 1]} : vector<16x256xf32> to vector<16x128xf32>
    %cst_6 = arith.constant 5.000000e-01 : f32
    %11 = vector.broadcast %cst_6 : f32 to vector<16x128xf32>
    %12 = arith.mulf %11, %10 : vector<16x128xf32>
    %cst_7 = arith.constant 0.707106769 : f32
    %13 = vector.broadcast %cst_7 : f32 to vector<16x128xf32>
    %14 = arith.mulf %10, %13 : vector<16x128xf32>
    %15 = math.erf %14 : vector<16x128xf32>
    %cst_8 = arith.constant 1.000000e+00 : f32
    %16 = vector.broadcast %cst_8 : f32 to vector<16x128xf32>
    %17 = arith.addf %16, %15 : vector<16x128xf32>
    %18 = arith.mulf %12, %17 : vector<16x128xf32>
    %19 = arith.mulf %9, %18 : vector<16x128xf32>
    %c0_9 = arith.constant 0 : index
    %c0_10 = arith.constant 0 : index
    %20 = vector.load %arg8[%c0_9, %c0_10] : memref<16x128xf32, #tpu.memory_space<vmem>>, vector<16x128xf32>
    %c0_11 = arith.constant 0 : index
    %c0_12 = arith.constant 0 : index
    %21 = vector.load %arg5[%c0_11, %c0_12] : memref<128x128xf32, #tpu.memory_space<vmem>>, vector<128x128xf32>
    %cst_13 = arith.constant dense<0.000000e+00> : vector<16x128xf32>
    %22 = tpu.matmul %19, %21, %cst_13 {dimension_numbers = #tpu.dot_dimension_numbers<[1], [0], [0], [1], [0, 0, 1, 1], [], []>} : vector<16x128xf32>, vector<128x128xf32>, vector<16x128xf32> -> vector<16x128xf32>
    %23 = arith.addf %20, %22 : vector<16x128xf32>
    %c0_14 = arith.constant 0 : index
    %c0_15 = arith.constant 0 : index
    %24 = vector.load %arg8[%c0_14, %c0_15] : memref<16x128xf32, #tpu.memory_space<vmem>>, vector<16x128xf32>
    tpu.vector_store %arg8[%c0_14, %c0_15], %23 {strides = array<i32>} : memref<16x128xf32, #tpu.memory_space<vmem>>, vector<16x128xf32>,
    %c0_i32_16 = arith.constant 0 : i32
    %25 = arith.cmpi eq, %arg1, %c0_i32_16 : i32
    %26 = arith.extui %25 : i1 to i32
    %c0_i32_17 = arith.constant 0 : i32
    %27 = arith.cmpi ne, %26, %c0_i32_17 : i32
    scf.if %27 {
      %c0_18 = arith.constant 0 : index
      %c0_19 = arith.constant 0 : index
      %28 = vector.load %arg8[%c0_18, %c0_19] : memref<16x128xf32, #tpu.memory_space<vmem>>, vector<16x128xf32>
      %c0_20 = arith.constant 0 : index
      %c0_21 = arith.constant 0 : index
      %29 = vector.load %arg6[%c0_20, %c0_21] : memref<1x128xf32, #tpu.memory_space<vmem>>, vector<1x128xf32>
      %30 = vector.broadcast %29 : vector<1x128xf32> to vector<16x128xf32>
      %31 = arith.addf %28, %30 : vector<16x128xf32>
      %c0_22 = arith.constant 0 : index
      %c0_23 = arith.constant 0 : index
      %32 = vector.load %arg7[%c0_22, %c0_23] : memref<16x128xf32, #tpu.memory_space<vmem>>, vector<16x128xf32>
      tpu.vector_store %arg7[%c0_22, %c0_23], %31 {strides = array<i32>} : memref<16x128xf32, #tpu.memory_space<vmem>>, vector<16x128xf32>,
    } else {
    }
    return
  }
  func.func @transform_0(%arg0: i32, %arg1: i32) -> (i32, i32) {
    %c0_i32 = arith.constant 0 : i32
    %c0_i32_0 = arith.constant 0 : i32
    return %arg0, %c0_i32 : i32, i32
  }
  func.func @transform_1(%arg0: i32, %arg1: i32) -> (i32, i32) {
    %c0_i32 = arith.constant 0 : i32
    %c0_i32_0 = arith.constant 0 : i32
    return %c0_i32, %arg1 : i32, i32
  }
  func.func @transform_2(%arg0: i32, %arg1: i32) -> (i32, i32) {
    %c0_i32 = arith.constant 0 : i32
    %c0_i32_0 = arith.constant 0 : i32
    return %c0_i32, %arg1 : i32, i32
  }
  func.func @transform_3(%arg0: i32, %arg1: i32) -> (i32, i32) {
    %c0_i32 = arith.constant 0 : i32
    %c0_i32_0 = arith.constant 0 : i32
    return %arg1, %c0_i32 : i32, i32
  }
  func.func @transform_4(%arg0: i32, %arg1: i32) -> (i32, i32) {
    %c0_i32 = arith.constant 0 : i32
    %c0_i32_0 = arith.constant 0 : i32
    %c0_i32_1 = arith.constant 0 : i32
    return %c0_i32, %c0_i32_0 : i32, i32
  }
  func.func @transform_5(%arg0: i32, %arg1: i32) -> (i32, i32) {
    %c0_i32 = arith.constant 0 : i32
    %c0_i32_0 = arith.constant 0 : i32
    return %arg0, %c0_i32 : i32, i32
  }
}

</mosaic_0001>

<bundles_post_ra>
// kernel: tpu_custom_call.1
= control target key start
LH: loop header
LB: loop body
LE: loop exit
PB: predicated region body
PF: predicated region fallthrough
CT: control target
= control target key end

     0   :  { %10 = vsyncpa [#allocation4], 0  ;;  %s555_s0 = inlined_call_operand.hbm [shape: f32[16,128], index: 0, kind: input, shape index: {}]   ;;  %s556_s1 = inlined_call_operand.hbm [shape: f32[128,256], index: 1, kind: input, shape index: {}]   ;;  %s557_s2 = inlined_call_operand.vmem [shape: f32[1,256], index: 2, kind: input, shape index: {}]   ;;  %s558_s3 = inlined_call_operand.hbm [shape: f32[128,128], index: 3, kind: input, shape index: {}]   ;;  %s559_s4 = inlined_call_operand.vmem [shape: f32[1,128], index: 4, kind: input, shape index: {}]   ;;  %s560_s5 = inlined_call_operand.hbm [shape: f32[16,128], index: 5, kind: output, shape index: {}]  }
   0x1   :  { %11 = vsyncpa [#allocation7], 0 }
   0x2   :  { %12 = vsyncpa [#allocation5], 0  ;;  %s487_s18 = smov [#allocation6]  }
   0x3   :  { %s30_s19 = sshll.u32 %s487_s18, 4  ;;  %s31_s19 = int_to_ptr.vmem [resolvable:$true] %s30_s19 }
   0x4   :  { %s409_s20 = scalar_lea.vmem %s31_s19, 4096  ;;  %p414_p1 = scmp.lt.s32.totalorder %s31_s19, %s31_s19 }
   0x5   :  { %p410_p0 = scmp.ne.s32.totalorder %s31_s19, %s409_s20  ;;  %p415_p2 = scmp.lt.s32.totalorder %s409_s20, %s409_s20 }
   0x7   :  { %p416_p3 = por %p415_p2, %p414_p1 }
   0x9   :  { %p417_p4 = pnand %p416_p3, %p410_p0 }
   0xb   :  { %420 = shalt.err (!%p417_p4)
}
   0xc   :  { %s488_s21 = smov 256   ;;  %s489_s22 = smov 16  }
   0xd   :  { %36 = dma.hbm_to_vmem [thread:$0]  %s556_s1, 4096, %s31_s19, [#allocation7], %s488_s21, %s488_s21, %s489_s22  }
   0xe   :  { %s490_s25 = smov [#allocation3]  }
   0xf   :  { %s18_s26 = sshll.u32 %s490_s25, 4  ;;  %s19_s26 = int_to_ptr.vmem [resolvable:$true] %s18_s26 }
  0x10   :  { %s429_s27 = scalar_lea.vmem %s19_s26, 256  ;;  %p434_p6 = scmp.lt.s32.totalorder %s19_s26, %s19_s26 }
  0x11   :  { %p430_p5 = scmp.ne.s32.totalorder %s19_s26, %s429_s27  ;;  %p435_p7 = scmp.lt.s32.totalorder %s429_s27, %s429_s27 }
  0x13   :  { %p436_p8 = por %p435_p7, %p434_p6 }
  0x15   :  { %p437_p9 = pnand %p436_p8, %p430_p5 }
  0x17   :  { %440 = shalt.err (!%p437_p9)
}
  0x18   :  { %s491_s28 = smov 128   ;;  %s492_s29 = smov 8  }
  0x19   :  { %24 = dma.hbm_to_vmem [thread:$0]  %s555_s0, 256, %s19_s26, [#allocation4], %s491_s28, %s491_s28, %s492_s29  }
  0x1a   :  { %s493_s1 = smov [#allocation8]  }
  0x1b   :  { %s44_s7 = sshll.u32 %s493_s1, 4  ;;  %s45_s7 = int_to_ptr.vmem [resolvable:$true] %s44_s7 }
  0x1c   :  { %s449_s8 = scalar_lea.vmem %s45_s7, 2048  ;;  %p454_p11 = scmp.lt.s32.totalorder %s45_s7, %s45_s7 }
  0x1d   :  { %p450_p10 = scmp.ne.s32.totalorder %s45_s7, %s449_s8  ;;  %p455_p12 = scmp.lt.s32.totalorder %s449_s8, %s449_s8 }
  0x1f   :  { %p456_p13 = por %p455_p12, %p454_p11 }
  0x21   :  { %p457_p0 = pnand %p456_p13, %p450_p10 }
  0x23   :  { %460 = shalt.err (!%p457_p0)
}
  0x24   :  { %50 = dma.hbm_to_vmem [thread:$0]  %s558_s3, 2048, %s45_s7, [#allocation7], %s491_s28, %s491_s28, %s492_s29  }
  0x25   :  { %481 = dma.done.wait [#allocation4], 256  }
  0x26   :  { %482 = vsyncadd [#allocation4], 4294967040 }
  0x27   :  { %483 = dma.done.wait [#allocation7], 6144  }
  0x28   :  { %484 = vsyncadd [#allocation7], 4294961152  ;;  %v494_v0 = vmov 0.0   ;;  %v101_v1 = vld [vmem:[#allocation6 + $0xf8] sm:$0xff]  ;;  %v100_v2 = vld [vmem:[#allocation6 + $0xf0] sm:$0xff]  ;;  %v104_v51 = vlaneseq  ;;  %s495_s12 = smov [#allocation9]  }
  0x29   :  { %178 = vmatprep.mubr.f32.mxu0 %v494_v0  ;;  %v99_v3 = vld [vmem:[#allocation6 + $0xe8] sm:$0xff]  ;;  %114 = vmatprep.subr.mxu0 %v101_v1  ;;  %v98_v4 = vld [vmem:[#allocation6 + $0xe0] sm:$0xff]  ;;  %v97_v5 = vld [vmem:[#allocation6 + $0xd8] sm:$0xff]  ;;  %s321_s13 = sshll.u32 %s495_s12, 4  ;;  %s322_s13 = int_to_ptr.vmem [resolvable:$true] %s321_s13 }
  0x2a   :  { %115 = vmatpush1.msra.mxu0 %v100_v2  ;;  %v96_v6 = vld [vmem:[#allocation6 + $0xd0] sm:$0xff]  ;;  %v95_v7 = vld [vmem:[#allocation6 + $0xc8] sm:$0xff]  ;;  %v94_v8 = vld [vmem:[#allocation6 + $0xc0] sm:$0xff]  ;;  %v105_v52 = vshrl.u32 %v104_v51, 7  ;;  %s461_s14 = scalar_lea.vmem %s322_s13, 256  ;;  %p466_p2 = scmp.lt.s32.totalorder %s322_s13, %s322_s13 }
  0x2b   :  { %116 = vmatprep.subr.mxu0 %v99_v3  ;;  %v93_v9 = vld [vmem:[#allocation6 + $0xb8] sm:$0xff]  ;;  %v92_v10 = vld [vmem:[#allocation6 + $0xb0] sm:$0xff]  ;;  %v91_v11 = vld [vmem:[#allocation6 + $0xa8] sm:$0xff]  ;;  %p462_p1 = scmp.ne.s32.totalorder %s322_s13, %s461_s14  ;;  %p467_p3 = scmp.lt.s32.totalorder %s461_s14, %s461_s14 }
  0x2c   :  { %117 = vmatpush1.msra.mxu0 %v98_v4  ;;  %v90_v12 = vld [vmem:[#allocation6 + $0xa0] sm:$0xff]  ;;  %v89_v13 = vld [vmem:[#allocation6 + $0x98] sm:$0xff]  ;;  %v88_v14 = vld [vmem:[#allocation6 + $0x90] sm:$0xff]  ;;  %v110_v53 = vsub.s32 1, %v105_v52 }
  0x2d   :  { %118 = vmatprep.subr.mxu0 %v97_v5  ;;  %v220_v15 = vld [vmem:[#allocation8 + $0x78] sm:$0xff]  ;;  %v87_v16 = vld [vmem:[#allocation6 + $0x88] sm:$0xff]  ;;  %v86_v17 = vld [vmem:[#allocation6 + $0x80] sm:$0xff]  ;;  %p468_p4 = por %p467_p3, %p466_p2 }
  0x2e   :  { %119 = vmatpush1.msra.mxu0 %v96_v6  ;;  %353 = vmatprep.subr.mxu1 %v220_v15  ;;  %v85_v18 = vld [vmem:[#allocation6 + $0x78] sm:$0xff]  ;;  %v84_v19 = vld [vmem:[#allocation6 + $0x70] sm:$0xff]  ;;  %v83_v20 = vld [vmem:[#allocation6 + $0x68] sm:$0xff] }
  0x2f   :  { %120 = vmatprep.subr.mxu0 %v95_v7  ;;  %354 = vmatpush3.msra.mxu1 %v220_v15  ;;  %v82_v21 = vld [vmem:[#allocation6 + $0x60] sm:$0xff]  ;;  %v81_v22 = vld [vmem:[#allocation6 + $0x58] sm:$0xff]  ;;  %v80_v23 = vld [vmem:[#allocation6 + $0x50] sm:$0xff]  ;;  %p469_p5 = pnand %p468_p4, %p462_p1 }
  0x30   :  { %121 = vmatpush1.msra.mxu0 %v94_v8  ;;  %v79_v24 = vld [vmem:[#allocation6 + $0x48] sm:$0xff]  ;;  %v78_v25 = vld [vmem:[#allocation6 + $0x40] sm:$0xff]  ;;  %v77_v26 = vld [vmem:[#allocation6 + $0x38] sm:$0xff] }
  0x31   :  { %122 = vmatprep.subr.mxu0 %v93_v9  ;;  %v76_v27 = vld [vmem:[#allocation6 + $0x30] sm:$0xff]  ;;  %v75_v28 = vld [vmem:[#allocation6 + $0x28] sm:$0xff]  ;;  %v74_v29 = vld [vmem:[#allocation6 + $0x20] sm:$0xff] }
  0x32   :  { %123 = vmatpush1.msra.mxu0 %v92_v10  ;;  %v73_v30 = vld [vmem:[#allocation6 + $0x18] sm:$0xff]  ;;  %v72_v31 = vld [vmem:[#allocation6 + $0x10] sm:$0xff]  ;;  %v71_v32 = vld [vmem:[#allocation6 + $0x8] sm:$0xff] }
  0x33   :  { %124 = vmatprep.subr.mxu0 %v91_v11  ;;  %v70_v33 = vld [vmem:[#allocation6] sm:$0xff]  ;;  %v68_v34 = vld [vmem:[#allocation3] sm:$0xff]  ;;  %v69_v35 = vld [vmem:[#allocation3 + $0x8] sm:$0xff] }
  0x34   :  { %125 = vmatpush1.msra.mxu0 %v90_v12  ;;  %v219_v36 = vld [vmem:[#allocation8 + $0x70] sm:$0xff]  ;;  %v218_v37 = vld [vmem:[#allocation8 + $0x68] sm:$0xff]  ;;  %v217_v38 = vld [vmem:[#allocation8 + $0x60] sm:$0xff] }
  0x35   :  { %126 = vmatprep.subr.mxu0 %v89_v13  ;;  %355 = vmatprep.subr.mxu1 %v219_v36  ;;  %v216_v39 = vld [vmem:[#allocation8 + $0x58] sm:$0xff]  ;;  %v215_v40 = vld [vmem:[#allocation8 + $0x50] sm:$0xff]  ;;  %v214_v41 = vld [vmem:[#allocation8 + $0x48] sm:$0xff] }
  0x36   :  { %127 = vmatpush1.msra.mxu0 %v88_v14  ;;  %356 = vmatpush3.msra.mxu1 %v219_v36  ;;  %v213_v42 = vld [vmem:[#allocation8 + $0x40] sm:$0xff]  ;;  %v212_v43 = vld [vmem:[#allocation8 + $0x38] sm:$0xff]  ;;  %v211_v44 = vld [vmem:[#allocation8 + $0x30] sm:$0xff] }
  0x37   :  { %128 = vmatprep.subr.mxu0 %v87_v16  ;;  %357 = vmatprep.subr.mxu1 %v218_v37  ;;  %v210_v45 = vld [vmem:[#allocation8 + $0x28] sm:$0xff]  ;;  %v209_v46 = vld [vmem:[#allocation8 + $0x20] sm:$0xff]  ;;  %v208_v47 = vld [vmem:[#allocation8 + $0x18] sm:$0xff] }
  0x38   :  { %129 = vmatpush1.msra.mxu0 %v86_v17  ;;  %358 = vmatpush3.msra.mxu1 %v218_v37  ;;  %v207_v48 = vld [vmem:[#allocation8 + $0x10] sm:$0xff]  ;;  %v206_v49 = vld [vmem:[#allocation8 + $0x8] sm:$0xff]  ;;  %v205_v50 = vld [vmem:[#allocation8] sm:$0xff] }
  0x39   :  { %130 = vmatprep.subr.mxu0 %v85_v18  ;;  %359 = vmatprep.subr.mxu1 %v217_v38  ;;  %v102_v54 = vld [vmem:[%s557_s2] sm:$0x3] }
  0x3a   :  { %131 = vmatpush1.msra.mxu0 %v84_v19  ;;  %360 = vmatpush3.msra.mxu1 %v217_v38  ;;  %v111_v55 = vrot.slane %v102_v54, %v110_v53  ;;  %v334_v14 = vld [vmem:[%s559_s4] ss:$0 sm:$0xff] }
  0x3b   :  { %132 = vmatprep.subr.mxu0 %v83_v20  ;;  %361 = vmatprep.subr.mxu1 %v216_v39 }
  0x3c   :  { %133 = vmatpush1.msra.mxu0 %v82_v21  ;;  %362 = vmatpush3.msra.mxu1 %v216_v39 }
  0x3d   :  { %134 = vmatprep.subr.mxu0 %v81_v22  ;;  %363 = vmatprep.subr.mxu1 %v215_v40 }
  0x3e   :  { %135 = vmatpush1.msra.mxu0 %v80_v23  ;;  %364 = vmatpush3.msra.mxu1 %v215_v40 }
  0x3f   :  { %136 = vmatprep.subr.mxu0 %v79_v24  ;;  %365 = vmatprep.subr.mxu1 %v214_v41 }
  0x40   :  { %137 = vmatpush1.msra.mxu0 %v78_v25  ;;  %366 = vmatpush3.msra.mxu1 %v214_v41 }
  0x41   :  { %138 = vmatprep.subr.mxu0 %v77_v26  ;;  %367 = vmatprep.subr.mxu1 %v213_v42 }
  0x42   :  { %139 = vmatpush1.msra.mxu0 %v76_v27  ;;  %368 = vmatpush3.msra.mxu1 %v213_v42 }
  0x43   :  { %140 = vmatprep.subr.mxu0 %v75_v28  ;;  %369 = vmatprep.subr.mxu1 %v212_v43 }
  0x44   :  { %141 = vmatpush1.msra.mxu0 %v74_v29  ;;  %370 = vmatpush3.msra.mxu1 %v212_v43 }
  0x45   :  { %142 = vmatprep.subr.mxu0 %v73_v30  ;;  %371 = vmatprep.subr.mxu1 %v211_v44 }
  0x46   :  { %143 = vmatpush1.msra.mxu0 %v72_v31  ;;  %372 = vmatpush3.msra.mxu1 %v211_v44 }
  0x47   :  { %144 = vmatprep.subr.mxu0 %v71_v32  ;;  %373 = vmatprep.subr.mxu1 %v210_v45 }
  0x48   :  { %145 = vmatpush1.msra.mxu0 %v70_v33  ;;  %374 = vmatpush3.msra.mxu1 %v210_v45 }
  0x49   :  { %179 = vmatmul.mubr.f32.vlgmr.msra.gmra.mxu0 %v68_v34  ;;  %375 = vmatprep.subr.mxu1 %v209_v46 }
  0x4a   :  { %184 = vmatprep.mubr.f32.mxu0 %v494_v0  ;;  %376 = vmatpush3.msra.mxu1 %v209_v46  ;;  %v106_v0 = vsub.s32 0, %v105_v52 }
  0x4b   :  { %377 = vmatprep.subr.mxu1 %v208_v47 }
  0x4c   :  { %378 = vmatpush3.msra.mxu1 %v208_v47  ;;  %v107_v1 = vrot.slane %v102_v54, %v106_v0 }
  0x4d   :  { %185 = vmatmul.mubr.f32.gmra.mxu0 %v69_v35  ;;  %379 = vmatprep.subr.mxu1 %v207_v48 }
  0x4e   :  { %380 = vmatpush3.msra.mxu1 %v207_v48 }
  0x4f   :  { %381 = vmatprep.subr.mxu1 %v206_v49 }
  0x50   :  { %382 = vmatpush3.msra.mxu1 %v206_v49 }
  0x51   :  { %383 = vmatprep.subr.mxu1 %v205_v50 }
  0x52   :  { %384 = vmatpush3.msra.mxu1 %v205_v50 }
 0x109   :  { %v180_v56 = vpop.f32.mrf.mxu0 }
 0x10a   :  { %v181_v5 = vadd.f32 %v180_v56, %v107_v1 }
 0x10b   :  { %v182_v57 = vpop.f32.mrf.mxu0 }
 0x10c   :  { %v183_v58 = vadd.f32 %v182_v57, %v111_v55 }
 0x10d   :  { %v186_v59 = vpop.f32.mrf.mxu0 }
 0x10e   :  { %v193_v60 = vmul.f32 0.70710677, %v183_v58  ;;  %v191_v3 = vmul.f32 0.5, %v183_v58  ;;  %v187_v11 = vadd.f32 %v186_v59, %v107_v1 }
 0x10f   :  { %v188_v61 = vpop.f32.mrf.mxu0 }
 0x110   :  { %397 = verf.f32 %v193_v60  ;;  %v189_v62 = vadd.f32 %v188_v61, %v111_v55 }
 0x112   :  { %v194_v63 = vmul.f32 0.70710677, %v189_v62  ;;  %v192_v8 = vmul.f32 0.5, %v189_v62 }
 0x114   :  { %399 = verf.f32 %v194_v63 }
 0x11d   :  { %v398_v2 = vpop.eup %397 }
 0x11e   :  { %v197_v4 = vadd.f32 1.0, %v398_v2 }
 0x120   :  { %v199_v6 = vmul.f32 %v197_v4, %v191_v3 }
 0x121   :  { %v400_v7 = vpop.eup %399 }
 0x122   :  { %v198_v9 = vadd.f32 1.0, %v400_v7  ;;  %v201_v10 = vmul.f32 %v199_v6, %v181_v5 }
 0x124   :  { %v200_v12 = vmul.f32 %v198_v9, %v192_v8  ;;  %385 = vmatprep.mubr.f32.mxu1 %v201_v10 }
 0x126   :  { %v202_v13 = vmul.f32 %v200_v12, %v187_v11 }
 0x128   :  { %386 = vmatmul.mubr.f32.vlgmr.msra.gmra.mxu1 %v202_v13 }
 0x1e8   :  { %v387_v15 = vpop.f32.mrf.mxu1 }
 0x1e9   :  { %v313_v16 = vadd.f32 %v387_v15, %v334_v14 }
 0x1ea   :  { %v287_v17 = vpop.f32.mrf.mxu1 }
 0x1eb   :  { %315 = vst [vmem:[#allocation9 + $0x8] sm:$0xff] %v313_v16  ;;  %v312_v18 = vadd.f32 %v334_v14, %v287_v17 }
 0x1ed   :  { %314 = vst [vmem:[#allocation9] sm:$0xff] %v312_v18 }
 0x1ee   :  { %472 = shalt.err (!%p469_p5)
}
 0x1ef   :  { %327 = dma.vmem_to_hbm [thread:$0]  %s322_s13, 256, %s560_s5, [#allocation5], %s491_s28, %s491_s28, %s492_s29  }
 0x1f0   :  { %485 = dma.done.wait [#allocation5], 256  }
 0x1f1   :  { %486 = vsyncadd [#allocation5], 4294967040 }
 0x1f2   :  { %331 = vsyncpa [#allocation4], 1 }
 0x1f3   :  { %332 = vsyncpa [#allocation7], 1 }
 0x1f4   :  { %333 = vsyncpa [#allocation5], 1 }

</bundles_post_ra>
